<compile_context>
chip_gen: v7x
topology: tpu7x:2x2x1
jax: 0.10.0
libtpu: 0.0.40
codegen_flags: <defaults>
</compile_context>

<pallas_src>
import functools

import jax
import jax.numpy as jnp
from jax import lax
from jax.experimental import pallas as pl
from jax.experimental.pallas import tpu as pltpu


def _ce_ie_kernel(logits_ref, labels_ref, out_ref, *, eps: float, b_actual: int):
    """One batch tile: emit sum_rows( -logp[label] + eps * sum_c p*logp )."""
    i = pl.program_id(0)

    x = logits_ref[...].astype(jnp.float32)          # (tb, c)
    labels = labels_ref[...]                          # (tb, 1) int32
    tb, c = x.shape

    # Validity mask for rows added by batch padding.
    row_local = lax.broadcasted_iota(jnp.int32, (tb, 1), 0)
    row_global = row_local + i * tb
    valid = row_global < b_actual                     # (tb, 1) bool

    # Numerically-stable shifted logits (softmax along class axis = lanes).
    m = jnp.max(x, axis=1, keepdims=True)             # (tb, 1)
    sh = x - m                                        # (tb, c)
    e = jnp.exp(sh)                                   # (tb, c)  (EUP)

    s = jnp.sum(e, axis=1, keepdims=True)             # (tb, 1)  sum exp
    t = jnp.sum(e * sh, axis=1, keepdims=True)        # (tb, 1)  sum exp*shifted

    class_ids = lax.broadcasted_iota(jnp.int32, (tb, c), 1)
    onehot = class_ids == labels                      # (tb, c)
    u = jnp.sum(jnp.where(onehot, sh, 0.0), axis=1, keepdims=True)  # sh[label]

    log_s = jnp.log(s)                                # (tb, 1)
    inv_s = pl.reciprocal(s, approx=False)            # (tb, 1)

    # per-row: ce_row + eps * reg_row
    #   ce_row  = log(s) - u
    #   reg_row = t/s - log(s)
    per_row = (log_s - u) + jnp.float32(eps) * (t * inv_s - log_s)
    per_row = jnp.where(valid, per_row, 0.0)

    partial = jnp.sum(per_row)                        # scalar f32

    # Lane-dense (1, 8, 128) output block; wrapper reads [:, 0, 0].
    out_ref[...] = jnp.broadcast_to(partial, out_ref.shape).astype(jnp.float32)


def _round_up(x: int, m: int) -> int:
    return ((x + m - 1) // m) * m


def ce_ie_loss(outputs, labels, eps: float = 0.5, target_tile_bytes: int = 2 * 1024 * 1024):
    """Pallas equivalent of CE_IELoss.forward(outputs, labels) (reduction='mean')."""
    b, c = outputs.shape
    itemsize = jnp.dtype(outputs.dtype).itemsize
    # Sublane packing alignment: f32 -> 8 rows, bf16 -> 16, int8/fp8 -> 32.
    sub = {4: 8, 2: 16, 1: 32}.get(itemsize, 8)

    # Rows per tile: big enough to pipeline well, small enough for VMEM on all gens,
    # and never (much) larger than the actual batch.
    tb = min(512, max(1, target_tile_bytes // max(1, c * itemsize)), _round_up(b, sub))
    tb = max(sub, (tb // sub) * sub)

    b_pad = _round_up(b, tb)
    num_tiles = b_pad // tb

    labels = labels.astype(jnp.int32)
    if b_pad != b:
        outputs = jnp.pad(outputs, ((0, b_pad - b), (0, 0)))
        labels = jnp.pad(labels, ((0, b_pad - b),))
    labels2d = labels.reshape(b_pad, 1)

    out = pl.pallas_call(
        functools.partial(_ce_ie_kernel, eps=float(eps), b_actual=b),
        out_shape=jax.ShapeDtypeStruct((num_tiles, 8, 128), jnp.float32),
        grid=(num_tiles,),
        in_specs=[
            pl.BlockSpec((tb, c), lambda i: (i, 0)),
            pl.BlockSpec((tb, 1), lambda i: (i, 0)),
        ],
        out_specs=pl.BlockSpec((1, 8, 128), lambda i: (i, 0, 0)),
        compiler_params=pltpu.CompilerParams(
            dimension_semantics=("parallel",),
        ),
    )(outputs, labels2d)

    partials = out[:, 0, 0]                           # (num_tiles,)
    return jnp.sum(partials) / jnp.float32(b)


def _reference(outputs, labels, eps=0.5):
    # Pure-JAX reference mirroring the PyTorch module.
    p = jax.nn.softmax(outputs.astype(jnp.float32), axis=1)
    logp = jnp.log(p)
    ce = -jnp.mean(logp[jnp.arange(outputs.shape[0]), labels])
    reg = jnp.mean(jnp.sum(p * logp, axis=1))
    return ce + reg * eps


if __name__ == "__main__":
    key = jax.random.PRNGKey(0)
    k1, k2 = jax.random.split(key)

    b, c = 8, 32  # small [batch, num_classes]
    outputs = jax.random.normal(k1, (b, c), dtype=jnp.float32)
    labels = jax.random.randint(k2, (b,), 0, c, dtype=jnp.int32)

    loss = ce_ie_loss(outputs, labels, eps=0.5)
    loss = jax.block_until_ready(loss)

    ref = _reference(outputs, labels, eps=0.5)
    assert jnp.allclose(loss, ref, rtol=1e-5, atol=1e-5), (loss, ref)

    # Also exercise a non-tile-aligned batch to hit the padding/mask path.
    b2, c2 = 13, 160
    outputs2 = jax.random.normal(k1, (b2, c2), dtype=jnp.float32)
    labels2 = jax.random.randint(k2, (b2,), 0, c2, dtype=jnp.int32)
    loss2 = jax.block_until_ready(ce_ie_loss(outputs2, labels2, eps=0.5))
    ref2 = _reference(outputs2, labels2, eps=0.5)
    assert jnp.allclose(loss2, ref2, rtol=1e-5, atol=1e-5), (loss2, ref2)

    print("KERNEL_OK")
</pallas_src>

<mosaic_0001>
module attributes {stable_mosaic.version = 11 : i64} {
  func.func @_ce_ie_kernel(%arg0: i32, %arg1: memref<8x32xf32, #tpu.memory_space<vmem>>, %arg2: memref<8x1xi32, #tpu.memory_space<vmem>>, %arg3: memref<1x8x128xf32, #tpu.memory_space<vmem>>) attributes {dimension_semantics = [#tpu.dimension_semantics<parallel>], iteration_bounds = array<i64: 1>, scalar_prefetch = 0 : i64, scratch_operands = 0 : i64, tpu.core_type = #tpu.core_type<tc>, window_params = [{transform_indices = @transform_0, window_bounds = array<i64: 8, 32>}, {transform_indices = @transform_1, window_bounds = array<i64: 8, 1>}, {transform_indices = @transform_2, window_bounds = array<i64: 1, 8, 128>}]} {
    %c0 = arith.constant 0 : index
    %c0_0 = arith.constant 0 : index
    %0 = vector.load %arg1[%c0, %c0_0] : memref<8x32xf32, #tpu.memory_space<vmem>>, vector<8x32xf32>
    %c0_1 = arith.constant 0 : index
    %c0_2 = arith.constant 0 : index
    %1 = vector.load %arg2[%c0_1, %c0_2] : memref<8x1xi32, #tpu.memory_space<vmem>>, vector<8x1xi32>
    %2 = tpu.iota {dimensions = array<i32: 0>} : vector<8x1xi32>
    %c8_i32 = arith.constant 8 : i32
    %3 = arith.muli %arg0, %c8_i32 : i32
    %4 = vector.broadcast %3 : i32 to vector<8x1xi32>
    %5 = arith.addi %2, %4 : vector<8x1xi32>
    %c8_i32_3 = arith.constant 8 : i32
    %6 = vector.broadcast %c8_i32_3 : i32 to vector<8x1xi32>
    %7 = arith.cmpi slt, %5, %6 : vector<8x1xi32>
    %cst = arith.constant dense<0xFF800000> : vector<8xf32>
    %8 = vector.multi_reduction <maximumf>, %0, %cst [1] : vector<8x32xf32> to vector<8xf32>
    %9 = vector.shape_cast %8 : vector<8xf32> to vector<8x1xf32>
    %10 = vector.broadcast %9 : vector<8x1xf32> to vector<8x32xf32>
    %11 = arith.subf %0, %10 : vector<8x32xf32>
    %12 = math.exp %11 : vector<8x32xf32>
    %cst_4 = arith.constant dense<0.000000e+00> : vector<8xf32>
    %13 = vector.multi_reduction <add>, %12, %cst_4 [1] : vector<8x32xf32> to vector<8xf32>
    %14 = vector.shape_cast %13 : vector<8xf32> to vector<8x1xf32>
    %15 = arith.mulf %12, %11 : vector<8x32xf32>
    %cst_5 = arith.constant dense<0.000000e+00> : vector<8xf32>
    %16 = vector.multi_reduction <add>, %15, %cst_5 [1] : vector<8x32xf32> to vector<8xf32>
    %17 = vector.shape_cast %16 : vector<8xf32> to vector<8x1xf32>
    %18 = tpu.iota {dimensions = array<i32: 1>} : vector<8x32xi32>
    %19 = vector.broadcast %1 : vector<8x1xi32> to vector<8x32xi32>
    %20 = arith.cmpi eq, %18, %19 : vector<8x32xi32>
    %cst_6 = arith.constant 0.000000e+00 : f32
    %21 = vector.broadcast %cst_6 : f32 to vector<8x32xf32>
    %22 = arith.select %20, %11, %21 : vector<8x32xi1>, vector<8x32xf32>
    %cst_7 = arith.constant dense<0.000000e+00> : vector<8xf32>
    %23 = vector.multi_reduction <add>, %22, %cst_7 [1] : vector<8x32xf32> to vector<8xf32>
    %24 = vector.shape_cast %23 : vector<8xf32> to vector<8x1xf32>
    %25 = math.log %14 : vector<8x1xf32>
    %26 = tpu.reciprocal %14 : vector<8x1xf32> -> vector<8x1xf32>
    %27 = arith.subf %25, %24 : vector<8x1xf32>
    %28 = arith.mulf %17, %26 : vector<8x1xf32>
    %29 = arith.subf %28, %25 : vector<8x1xf32>
    %cst_8 = arith.constant 5.000000e-01 : f32
    %30 = vector.broadcast %cst_8 : f32 to vector<8x1xf32>
    %31 = arith.mulf %30, %29 : vector<8x1xf32>
    %32 = arith.addf %27, %31 : vector<8x1xf32>
    %cst_9 = arith.constant 0.000000e+00 : f32
    %33 = vector.broadcast %cst_9 : f32 to vector<8x1xf32>
    %34 = arith.select %7, %32, %33 : vector<8x1xi1>, vector<8x1xf32>
    %35 = vector.shape_cast %34 : vector<8x1xf32> to vector<1x8x1xf32>
    %cst_10 = arith.constant dense<0.000000e+00> : vector<1xf32>
    %36 = vector.multi_reduction <add>, %35, %cst_10 [1, 2] : vector<1x8x1xf32> to vector<1xf32>
    %37 = vector.shape_cast %36 : vector<1xf32> to vector<1x1x1xf32>
    %38 = vector.extract %37[0, 0, 0] : f32 from vector<1x1x1xf32>
    %39 = vector.broadcast %38 : f32 to vector<1x8x128xf32>
    %c0_11 = arith.constant 0 : index
    %c0_12 = arith.constant 0 : index
    %c0_13 = arith.constant 0 : index
    %40 = vector.load %arg3[%c0_11, %c0_12, %c0_13] : memref<1x8x128xf32, #tpu.memory_space<vmem>>, vector<1x8x128xf32>
    tpu.vector_store %arg3[%c0_11, %c0_12, %c0_13], %39 {strides = array<i32>} : memref<1x8x128xf32, #tpu.memory_space<vmem>>, vector<1x8x128xf32>,
    return
  }
  func.func @transform_0(%arg0: i32) -> (i32, i32) {
    %c0_i32 = arith.constant 0 : i32
    %c0_i32_0 = arith.constant 0 : i32
    return %arg0, %c0_i32 : i32, i32
  }
  func.func @transform_1(%arg0: i32) -> (i32, i32) {
    %c0_i32 = arith.constant 0 : i32
    %c0_i32_0 = arith.constant 0 : i32
    return %arg0, %c0_i32 : i32, i32
  }
  func.func @transform_2(%arg0: i32) -> (i32, i32, i32) {
    %c0_i32 = arith.constant 0 : i32
    %c0_i32_0 = arith.constant 0 : i32
    %c0_i32_1 = arith.constant 0 : i32
    return %arg0, %c0_i32, %c0_i32_0 : i32, i32, i32
  }
}

</mosaic_0001>

<bundles_post_ra>
// kernel: tpu_custom_call.1
= control target key start
LH: loop header
LB: loop body
LE: loop exit
PB: predicated region body
PF: predicated region fallthrough
CT: control target
= control target key end

     0   :  { %vm20_vm0 = vcmask 261120   ;;  %s154_s0 = inlined_call_operand.vmem [shape: f32[8,32], index: 0, kind: input, shape index: {}]   ;;  %s155_s1 = inlined_call_operand.vmem [shape: s32[8,1], index: 1, kind: input, shape index: {}]   ;;  %s156_s2 = inlined_call_operand.hbm [shape: f32[1,8,128], index: 2, kind: output, shape index: {}]  }
   0x1   :  { %v12_v0 = vld [vmem:[%s154_s0] sm:$0xff] }
   0x2   :  { %7 = vsyncpa [#allocation3], 0  ;;  %v21_v1 = vsel %vm20_vm0, %v12_v0, -inf  ;;  %v115_v2 = vmov 0   ;;  %v13_v3 = vld [vmem:[%s155_s1] sm:$0xff]  ;;  %v34_v7 = vlaneseq  ;;  %vm53_vm2 = vcmask 7168  }
   0x3   :  { %84 = vset.pattern.permute.xlu0 %v115_v2  ;;  %s116_s0 = smov [#allocation2]  }
   0x4   :  { %22 = vmax.xlane.f32.xlu0 %v21_v1  ;;  %v35_v8 = vand.u32 127, %v34_v7  ;;  %s72_s1 = sshll.u32 %s116_s0, 4  ;;  %s73_s1 = int_to_ptr.vmem [resolvable:$true] %s72_s1 }
   0x5   :  { %s91_s14 = scalar_lea.vmem %s73_s1, 128  ;;  %p96_p1 = scmp.lt.s32.totalorder %s73_s1, %s73_s1 }
   0x6   :  { %p92_p0 = scmp.ne.s32.totalorder %s73_s1, %s91_s14  ;;  %p97_p2 = scmp.lt.s32.totalorder %s91_s14, %s91_s14 }
   0x8   :  { %p98_p3 = por %p97_p2, %p96_p1 }
   0xa   :  { %p99_p4 = pnand %p98_p3, %p92_p0 }
  0x1a   :  { %37 = vperm.xlu0 %84, %v13_v3  }
  0x91   :  { %v23_v4 = vpop.xlane.xlu0 %22 }
  0x92   :  { %v24_v5 = vsub.f32 %v12_v0, %v23_v4 }
  0x94   :  { %v25_v6 = vmul.f32 1.442695, %v24_v5 }
  0x96   :  { %85 = vpow2.f32 %v25_v6 }
  0x99   :  { %v38_v10 = vpop.permute.xlu0 %37 }
  0x9a   :  { %vm39_vm1 = vcmp.eq.s32.totalorder %v35_v8, %v38_v10 }
  0x9b   :  { %v40_v14 = vsel %vm39_vm1, %v24_v5, 0.0 }
  0x9c   :  { %v41_v15 = vsel %vm20_vm0, %v40_v14, 0.0 }
  0xa0   :  { %v86_v9 = vpop.eup %85 }
  0xa1   :  { %v27_v11 = vsel %vm20_vm0, %v86_v9, 0.0  ;;  %v30_v12 = vmul.f32 %v86_v9, %v24_v5 }
  0xa2   :  { %28 = vadd.xlane.f32.xlu1 %v27_v11 }
  0xa3   :  { %v31_v13 = vsel %vm20_vm0, %v30_v12, 0.0 }
  0xa6   :  { %32 = vadd.xlane.f32.xlu1 %v31_v13 }
  0xaa   :  { %42 = vadd.xlane.f32.xlu1 %v41_v15 }
 0x12f   :  { %v29_v16 = vpop.xlane.xlu1 %28 }
 0x130   :  { %87 = vlog2.f32 %v29_v16 }
 0x131   :  { %89 = vrcp.f32 %v29_v16 }
 0x133   :  { %v33_v17 = vpop.xlane.xlu1 %32 }
 0x137   :  { %v43_v23 = vpop.xlane.xlu1 %42 }
 0x13a   :  { %v88_v18 = vpop.eup %87 }
 0x13b   :  { %v90_v19 = vpop.eup %89  ;;  %v45_v20 = vmul.f32 0.6931472, %v88_v18 }
 0x13c   :  { %v48_v21 = vmul.f32 %v90_v19, %v33_v17 }
 0x13d   :  { %v47_v25 = vsub.f32 %v45_v20, %v43_v23 }
 0x13e   :  { %v49_v22 = vsub.f32 %v48_v21, %v45_v20 }
 0x140   :  { %v50_v24 = vmul.f32 0.5, %v49_v22 }
 0x142   :  { %v51_v26 = vadd.f32 %v50_v24, %v47_v25 }
 0x144   :  { %v54_v27 = vsel %vm53_vm2, %v51_v26, 0.0 }
 0x145   :  { %55 = vadd.xlane.f32.xlu1 %v54_v27 }
 0x1d2   :  { %v56_v28 = vpop.xlane.xlu1 %55 }
 0x1d3   :  { %v57_v29 = vrot.slane %v56_v28, 4 }
 0x1d5   :  { %v58_v30 = vadd.f32 %v57_v29, %v56_v28 }
 0x1d7   :  { %v59_v31 = vrot.slane %v58_v30, 2 }
 0x1d9   :  { %v60_v32 = vadd.f32 %v59_v31, %v58_v30 }
 0x1db   :  { %v61_v33 = vrot.slane %v60_v32, 1 }
 0x1dd   :  { %v62_v34 = vadd.f32 %v61_v33, %v60_v32 }
 0x1df   :  { %80 = vpush %v62_v34 }
 0x210   :  { %s81_s13 = spop %80 }
 0x211   :  { %v64_v35 = vstv %s81_s13 }
 0x212   :  { %65 = vst [vmem:[#allocation2] sm:$0xff] %v64_v35 }
 0x213   :  { %102 = shalt.err (!%p99_p4)
}
 0x214   :  { %s103_s17 = scalar_lea.hbm %s156_s2, 128 }
 0x215   :  { %p104_p5 = scmp.ne.s32.totalorder %s156_s2, %s103_s17  ;;  %p107_p6 = scmp.lt.u32.totalorder %s103_s17, %s156_s2 }
 0x217   :  { %p109_p7 = pnand %p107_p6, %p104_p5 }
 0x219   :  { %112 = shalt.err (!%p109_p7)
}
 0x21a   :  { %75 = dma.vmem_to_hbm [thread:$0]  %s73_s1, 128, %s156_s2, [#allocation3]  }
 0x21b   :  { %113 = dma.done.wait [#allocation3], 128  }
 0x21c   :  { %114 = vsyncadd [#allocation3], 4294967168 }
 0x21d   :  { %79 = vsyncpa [#allocation3], 1 }

</bundles_post_ra>
